<compile_context>
chip_gen: v7x
topology: tpu7x:2x2x1
jax: 0.10.0
libtpu: 0.0.40
codegen_flags: <defaults>
</compile_context>

<pallas_src>
import functools

import jax
import jax.numpy as jnp
import numpy as np
from jax.experimental import pallas as pl
from jax.experimental.pallas import tpu as pltpu

_LANE = 128


def _round_up(x, m):
    return ((x + m - 1) // m) * m


def _largest_divisor_tile(dim, target, align):
    """Largest multiple of `align` dividing `dim`, <= target.

    `dim` is always a multiple of `align` here (dims are padded first), so the
    result is always a legal tile (worst case `align` itself) — no pathological
    full-extent fallback that could blow the VMEM budget.
    """
    if dim <= target:
        return dim
    t = (target // align) * align
    while t > align:
        if dim % t == 0:
            return t
        t -= align
    return align


# ------------------------------------------------------------------ kernels -

def _affine_full_k_kernel(x_ref, wt_ref, b_ref, o_ref):
    """y = x @ W^T + b for one (tm, tn) tile; full contraction in one block.

    No reduction grid axis -> no accumulator scratch, no init/finalize
    branches, no per-K read-modify-write of a (tm, tn) f32 accumulator
    (important on v5e where the single vst slot saturates first).
    """
    acc = jnp.dot(x_ref[...], wt_ref[...], preferred_element_type=jnp.float32)
    o_ref[...] = (acc + b_ref[...].astype(jnp.float32)).astype(o_ref.dtype)


def _affine_ksplit_kernel(x_ref, wt_ref, b_ref, o_ref, acc_ref):
    """Fallback for very large K*N layers: K-innermost accumulator pattern."""
    k = pl.program_id(2)

    @pl.when(k == 0)
    def _init():
        acc_ref[...] = jnp.zeros_like(acc_ref)

    acc_ref[...] += jnp.dot(x_ref[...], wt_ref[...],
                            preferred_element_type=jnp.float32)

    @pl.when(k == pl.num_programs(2) - 1)
    def _finalize():
        o_ref[...] = (acc_ref[...]
                      + b_ref[...].astype(jnp.float32)).astype(o_ref.dtype)


# ------------------------------------------------------- parameter prepare --

def prepare_orthonormal_linear_params(weight, bias=None, *, compute_dtype=None):
    """One-time (model-preparation) conversion of PyTorch-layout parameters.

    weight: [out_dim, feat_dim] -> W^T zero-padded to [K_pad, N_pad]
    bias:   [1, out_dim] / [out_dim] / None -> f32 [1, N_pad]
    Zero padding of K and N is exact for the affine transform; padding N to a
    multiple of 128 makes every output store lane-dense (unmasked vst).
    `compute_dtype=jnp.bfloat16` casts the weight for bf16 MXU operands
    (accumulation stays f32) — gated: changes numerics vs. the f32 reference.
    """
    out_dim, feat_dim = weight.shape
    dt = jnp.dtype(compute_dtype) if compute_dtype is not None \
        else jnp.dtype(weight.dtype)
    k_pad = _round_up(feat_dim, _LANE)
    n_pad = _round_up(out_dim, _LANE)

    w_t = jnp.zeros((k_pad, n_pad), dtype=dt)
    w_t = w_t.at[:feat_dim, :out_dim].set(jnp.asarray(weight).T.astype(dt))

    b = jnp.zeros((1, n_pad), dtype=jnp.float32)
    if bias is not None:
        b = b.at[0, :out_dim].set(
            jnp.asarray(bias).reshape(-1).astype(jnp.float32))
    return w_t, b


# --------------------------------------------------------------- forward ----

@functools.partial(jax.jit,
                   static_argnames=("out_dim", "vmem_budget_bytes",
                                    "vmem_limit_bytes"))
def orthonormal_linear_forward(x, w_t, bias2d, *, out_dim,
                               vmem_budget_bytes=24 * 1024 * 1024,
                               vmem_limit_bytes=32 * 1024 * 1024):
    """Eval-mode forward of OrthonormalLinear: y = x @ weight.T + bias.

    x:       [..., feat_dim]  (any number of leading dims)
    w_t:     [K_pad, N_pad]   pre-transposed, zero-padded weight (prepare_*)
    bias2d:  [1, N_pad]       zero-padded f32 bias (all-zeros when bias=False)
    out_dim: original output dimension (static) used to slice the result.
    """
    *lead, feat_dim = x.shape
    k_pad, n_pad = w_t.shape
    compute_dtype = w_t.dtype
    out_dtype = x.dtype
    m = int(np.prod(lead)) if lead else 1

    ebytes = jnp.dtype(compute_dtype).itemsize
    obytes = jnp.dtype(out_dtype).itemsize
    sub = 8 * (4 // ebytes)          # sublane packing: 8 for f32, 16 for bf16

    # -- flatten / cast / zero-pad the contraction dim (exact for matmul) --
    xf = x.reshape(m, feat_dim).astype(compute_dtype)
    if feat_dim != k_pad:
        xf = jnp.pad(xf, ((0, 0), (0, k_pad - feat_dim)))

    # -- row tiling: big tiles amortize the ~0.35us per-grid-step overhead --
    tm = _round_up(m, sub) if m <= 1024 else 512
    m_pad = _round_up(m, tm)
    if m_pad != m:
        xf = jnp.pad(xf, ((0, m_pad - m), (0, 0)))

    def _fits(tm_, tn_, tk_, with_acc):
        # Double-buffered input/output tiles + optional f32 accumulator.
        total = (2 * tm_ * tk_ * ebytes          # x tile
                 + 2 * tk_ * tn_ * ebytes        # W^T tile
                 + 2 * 8 * tn_ * 4               # bias tile (sublane-padded)
                 + 2 * tm_ * tn_ * obytes        # output tile
                 + (tm_ * tn_ * 4 if with_acc else 0))
        return total <= vmem_budget_bytes

    # -- preferred structure: full K, widest N tile that fits (prefer full N
    #    so the weight index_map is grid-invariant -> resident in VMEM). --
    full_cfg = None
    for tm_c in (tm, 256, 128, 64, 32, 16, 8):
        if tm_c > tm or tm_c % sub or m_pad % tm_c:
            continue
        for tn_c in (n_pad, 1024, 512, 256, 128):
            if tn_c > n_pad or n_pad % tn_c:
                continue
            if _fits(tm_c, tn_c, k_pad, False):
                full_cfg = (tm_c, tn_c)
                break
        if full_cfg is not None:
            break

    if full_cfg is not None:
        tm_, tn_ = full_cfg
        grid = (m_pad // tm_, n_pad // tn_)
        out = pl.pallas_call(
            _affine_full_k_kernel,
            out_shape=jax.ShapeDtypeStruct((m_pad, n_pad), out_dtype),
            grid_spec=pltpu.PrefetchScalarGridSpec(
                num_scalar_prefetch=0,
                grid=grid,
                in_specs=[
                    pl.BlockSpec((tm_, k_pad), lambda i, j: (i, 0)),   # x rows
                    pl.BlockSpec((k_pad, tn_), lambda i, j: (0, j)),   # W^T
                    pl.BlockSpec((1, tn_), lambda i, j: (0, j)),       # bias
                ],
                out_specs=pl.BlockSpec((tm_, tn_), lambda i, j: (i, j)),
            ),
            compiler_params=pltpu.CompilerParams(
                dimension_semantics=("parallel", "parallel"),
                vmem_limit_bytes=vmem_limit_bytes),
        )(xf, w_t, bias2d)
    else:
        # -- fallback: K-split accumulator (huge K*N only) --
        cfg = None
        for tgt in ((512, 512, 1024), (512, 256, 1024), (256, 256, 1024),
                    (256, 256, 512), (128, 256, 512), (128, 128, 512),
                    (128, 128, 256), (64, 128, 256), (32, 128, 128),
                    (8, 128, 128)):
            tm_ = _largest_divisor_tile(m_pad, tgt[0], sub)
            tn_ = _largest_divisor_tile(n_pad, tgt[1], _LANE)
            tk_ = _largest_divisor_tile(k_pad, tgt[2], _LANE)
            if _fits(tm_, tn_, tk_, True):
                cfg = (tm_, tn_, tk_)
                break
        if cfg is None:                    # cannot happen with a >=16MiB budget
            cfg = (sub, _LANE, _LANE)
        tm_, tn_, tk_ = cfg
        grid = (m_pad // tm_, n_pad // tn_, k_pad // tk_)
        out = pl.pallas_call(
            _affine_ksplit_kernel,
            out_shape=jax.ShapeDtypeStruct((m_pad, n_pad), out_dtype),
            grid_spec=pltpu.PrefetchScalarGridSpec(
                num_scalar_prefetch=0,
                grid=grid,
                in_specs=[
                    pl.BlockSpec((tm_, tk_), lambda i, j, k: (i, k)),
                    pl.BlockSpec((tk_, tn_), lambda i, j, k: (k, j)),
                    pl.BlockSpec((1, tn_), lambda i, j, k: (0, j)),
                ],
                out_specs=pl.BlockSpec((tm_, tn_), lambda i, j, k: (i, j)),
                scratch_shapes=[pltpu.VMEM((tm_, tn_), jnp.float32)],
            ),
            compiler_params=pltpu.CompilerParams(
                dimension_semantics=("parallel", "parallel", "arbitrary"),
                vmem_limit_bytes=vmem_limit_bytes),
        )(xf, w_t, bias2d)

    out = out[:m, :out_dim]
    return out.reshape(*lead, out_dim)


def orthonormal_linear(x, weight, bias=None, *, compute_dtype=None):
    """Convenience wrapper taking PyTorch-layout parameters.

    For inference loops, call prepare_orthonormal_linear_params once and reuse
    the prepared weight — this wrapper re-pads/transposes on every call.
    """
    w_t, b2 = prepare_orthonormal_linear_params(weight, bias,
                                                compute_dtype=compute_dtype)
    return orthonormal_linear_forward(x, w_t, b2, out_dim=weight.shape[0])


def _reference(x, weight, bias):
    y = jnp.einsum("...k,nk->...n", x, weight)
    if bias is not None:
        y = y + bias.reshape(1, -1)
    return y


if __name__ == "__main__":
    key = jax.random.PRNGKey(0)
    kw, kb, kx, kw2, kb2, kx2 = jax.random.split(key, 6)

    # ---- small shapes consistent with the module (speech feature seq) ----
    batch, seq, feat_dim, out_dim = 2, 8, 32, 64
    # NaturalAffineTransform.init_parameters(): weight ~ N(0,1)/sqrt(in*out)
    weight = (jax.random.normal(kw, (out_dim, feat_dim), dtype=jnp.float32)
              / np.sqrt(feat_dim * out_dim))
    bias = jax.random.normal(kb, (1, out_dim), dtype=jnp.float32)
    x = jax.random.normal(kx, (batch, seq, feat_dim), dtype=jnp.float32)

    w_t, b2 = prepare_orthonormal_linear_params(weight, bias)  # model prep (once)
    y = jax.block_until_ready(
        orthonormal_linear_forward(x, w_t, b2, out_dim=out_dim))
    np.testing.assert_allclose(np.asarray(y),
                               np.asarray(_reference(x, weight, bias)),
                               rtol=1e-5, atol=1e-5)

    # ---- TDNN-sized layer: exercises the full-K resident-weight path ----
    b2n, t2, f2, o2 = 4, 128, 1024, 384
    weight2 = (jax.random.normal(kw2, (o2, f2), dtype=jnp.float32)
               / np.sqrt(f2 * o2))
    bias2 = jax.random.normal(kb2, (1, o2), dtype=jnp.float32)
    x2 = jax.random.normal(kx2, (b2n, t2, f2), dtype=jnp.float32)

    wt2, bb2 = prepare_orthonormal_linear_params(weight2, bias2)
    y2 = jax.block_until_ready(
        orthonormal_linear_forward(x2, wt2, bb2, out_dim=o2))
    np.testing.assert_allclose(np.asarray(y2),
                               np.asarray(_reference(x2, weight2, bias2)),
                               rtol=1e-4, atol=1e-5)

    # ---- bias=False path via the convenience wrapper ----
    y3 = jax.block_until_ready(orthonormal_linear(x, weight, None))
    np.testing.assert_allclose(np.asarray(y3),
                               np.asarray(_reference(x, weight, None)),
                               rtol=1e-5, atol=1e-5)

    print("KERNEL_OK")
</pallas_src>

<mosaic_0001>
module attributes {stable_mosaic.version = 11 : i64} {
  func.func @_affine_full_k_kernel(%arg0: i32, %arg1: i32, %arg2: memref<16x128xf32, #tpu.memory_space<vmem>>, %arg3: memref<128x128xf32, #tpu.memory_space<vmem>>, %arg4: memref<1x128xf32, #tpu.memory_space<vmem>>, %arg5: memref<16x128xf32, #tpu.memory_space<vmem>>) attributes {dimension_semantics = [#tpu.dimension_semantics<parallel>, #tpu.dimension_semantics<parallel>], iteration_bounds = array<i64: 1, 1>, scalar_prefetch = 0 : i64, scratch_operands = 0 : i64, tpu.core_type = #tpu.core_type<tc>, window_params = [{transform_indices = @transform_0, window_bounds = array<i64: 16, 128>}, {transform_indices = @transform_1, window_bounds = array<i64: 128, 128>}, {transform_indices = @transform_2, window_bounds = array<i64: 1, 128>}, {transform_indices = @transform_3, window_bounds = array<i64: 16, 128>}]} {
    %c0 = arith.constant 0 : index
    %c0_0 = arith.constant 0 : index
    %0 = vector.load %arg2[%c0, %c0_0] : memref<16x128xf32, #tpu.memory_space<vmem>>, vector<16x128xf32>
    %c0_1 = arith.constant 0 : index
    %c0_2 = arith.constant 0 : index
    %1 = vector.load %arg3[%c0_1, %c0_2] : memref<128x128xf32, #tpu.memory_space<vmem>>, vector<128x128xf32>
    %cst = arith.constant dense<0.000000e+00> : vector<16x128xf32>
    %2 = tpu.matmul %0, %1, %cst {dimension_numbers = #tpu.dot_dimension_numbers<[1], [0], [0], [1], [0, 0, 1, 1], [], []>} : vector<16x128xf32>, vector<128x128xf32>, vector<16x128xf32> -> vector<16x128xf32>
    %c0_3 = arith.constant 0 : index
    %c0_4 = arith.constant 0 : index
    %3 = vector.load %arg4[%c0_3, %c0_4] : memref<1x128xf32, #tpu.memory_space<vmem>>, vector<1x128xf32>
    %4 = vector.broadcast %3 : vector<1x128xf32> to vector<16x128xf32>
    %5 = arith.addf %2, %4 : vector<16x128xf32>
    %c0_5 = arith.constant 0 : index
    %c0_6 = arith.constant 0 : index
    %6 = vector.load %arg5[%c0_5, %c0_6] : memref<16x128xf32, #tpu.memory_space<vmem>>, vector<16x128xf32>
    tpu.vector_store %arg5[%c0_5, %c0_6], %5 {strides = array<i32>} : memref<16x128xf32, #tpu.memory_space<vmem>>, vector<16x128xf32>,
    return
  }
  func.func @transform_0(%arg0: i32, %arg1: i32) -> (i32, i32) {
    %c0_i32 = arith.constant 0 : i32
    %c0_i32_0 = arith.constant 0 : i32
    return %arg0, %c0_i32 : i32, i32
  }
  func.func @transform_1(%arg0: i32, %arg1: i32) -> (i32, i32) {
    %c0_i32 = arith.constant 0 : i32
    %c0_i32_0 = arith.constant 0 : i32
    return %c0_i32, %arg1 : i32, i32
  }
  func.func @transform_2(%arg0: i32, %arg1: i32) -> (i32, i32) {
    %c0_i32 = arith.constant 0 : i32
    %c0_i32_0 = arith.constant 0 : i32
    return %c0_i32, %arg1 : i32, i32
  }
  func.func @transform_3(%arg0: i32, %arg1: i32) -> (i32, i32) {
    %c0_i32 = arith.constant 0 : i32
    return %arg0, %arg1 : i32, i32
  }
}

</mosaic_0001>

<bundles_post_ra>
// kernel: orthonormal_linear_forward.1
= control target key start
LH: loop header
LB: loop body
LE: loop exit
PB: predicated region body
PF: predicated region fallthrough
CT: control target
= control target key end

     0   :  { %8 = vsyncpa [#allocation3], 0  ;;  %s248_s12 = smov [#allocation2]   ;;  %s298_s0 = inlined_call_operand.vmem [shape: f32[16,128], index: 0, kind: input, shape index: {}]   ;;  %s299_s1 = inlined_call_operand.hbm [shape: f32[128,128], index: 1, kind: input, shape index: {}]   ;;  %s300_s2 = inlined_call_operand.vmem [shape: f32[1,128], index: 2, kind: input, shape index: {}]   ;;  %s301_s3 = inlined_call_operand.vmem [shape: f32[16,128], index: 3, kind: output, shape index: {}]  }
   0x1   :  { %s16_s13 = sshll.u32 %s248_s12, 4  ;;  %s224_s16 = scalar_lea.hbm %s299_s1, 2048  ;;  %s17_s13 = int_to_ptr.vmem [resolvable:$true] %s16_s13 }
   0x2   :  { %p225_p0 = scmp.ne.s32.totalorder %s299_s1, %s224_s16  ;;  %p228_p1 = scmp.lt.u32.totalorder %s224_s16, %s299_s1 }
   0x4   :  { %p230_p2 = pnand %p228_p1, %p225_p0 }
   0x6   :  { %233 = shalt.err (!%p230_p2)
}
   0x7   :  { %s234_s21 = scalar_lea.vmem %s17_s13, 2048  ;;  %p239_p4 = scmp.lt.s32.totalorder %s17_s13, %s17_s13 }
   0x8   :  { %p235_p3 = scmp.ne.s32.totalorder %s17_s13, %s234_s21  ;;  %p240_p5 = scmp.lt.s32.totalorder %s234_s21, %s234_s21 }
   0xa   :  { %p241_p6 = por %p240_p5, %p239_p4 }
   0xc   :  { %p242_p7 = pnand %p241_p6, %p235_p3 }
   0xe   :  { %245 = shalt.err (!%p242_p7)
}
   0xf   :  { %s249_s22 = smov 128   ;;  %s250_s23 = smov 8  }
  0x10   :  { %22 = dma.hbm_to_vmem [thread:$0]  %s299_s1, 2048, %s17_s13, [#allocation3], %s249_s22, %s249_s22, %s250_s23  }
  0x11   :  { %246 = dma.done.wait [#allocation3], 2048  }
  0x12   :  { %247 = vsyncadd [#allocation3], 4294965248  ;;  %v30_v0 = vld [vmem:[#allocation2] sm:$0xff]  ;;  %v31_v1 = vld [vmem:[#allocation2 + $0x8] sm:$0xff] }
  0x13   :  { %v32_v2 = vld [vmem:[#allocation2 + $0x10] sm:$0xff]  ;;  %v189_v3 = vpack.c.bf16 %v31_v1, %v30_v0  ;;  %v33_v4 = vld [vmem:[#allocation2 + $0x18] sm:$0xff]  ;;  %v34_v6 = vld [vmem:[#allocation2 + $0x20] sm:$0xff] }
  0x14   :  { %v193_v5 = vpack.c.bf16 %v33_v4, %v32_v2  ;;  %v35_v7 = vld [vmem:[#allocation2 + $0x28] sm:$0xff]  ;;  %v28_v9 = vld [vmem:[%s298_s0] sm:$0xff]  ;;  %v36_v10 = vld [vmem:[#allocation2 + $0x30] sm:$0xff] }
  0x15   :  { %190 = vmatprep.subr.bf16.mxu0 %v189_v3  ;;  %v197_v8 = vpack.c.bf16 %v35_v7, %v34_v6  ;;  %v37_v11 = vld [vmem:[#allocation2 + $0x38] sm:$0xff]  ;;  %186 = vmatprep.mubr.f32.mxu0 %v28_v9  ;;  %v38_v13 = vld [vmem:[#allocation2 + $0x40] sm:$0xff]  ;;  %v39_v14 = vld [vmem:[#allocation2 + $0x48] sm:$0xff] }
  0x16   :  { %192 = vmatpush3.bf16.msra.mxu0 %v189_v3  ;;  %v201_v12 = vpack.c.bf16 %v37_v11, %v36_v10  ;;  %v205_v15 = vpack.c.bf16 %v39_v14, %v38_v13  ;;  %v40_v16 = vld [vmem:[#allocation2 + $0x50] sm:$0xff]  ;;  %v41_v17 = vld [vmem:[#allocation2 + $0x58] sm:$0xff]  ;;  %v42_v19 = vld [vmem:[#allocation2 + $0x60] sm:$0xff] }
  0x17   :  { %194 = vmatprep.subr.bf16.mxu0 %v193_v5  ;;  %v209_v18 = vpack.c.bf16 %v41_v17, %v40_v16  ;;  %v43_v20 = vld [vmem:[#allocation2 + $0x68] sm:$0xff]  ;;  %v44_v22 = vld [vmem:[#allocation2 + $0x70] sm:$0xff]  ;;  %v45_v23 = vld [vmem:[#allocation2 + $0x78] sm:$0xff] }
  0x18   :  { %v213_v21 = vpack.c.bf16 %v43_v20, %v42_v19  ;;  %v217_v24 = vpack.c.bf16 %v45_v23, %v44_v22  ;;  %v29_v25 = vld [vmem:[%s298_s0 + $0x8] sm:$0xff]  ;;  %v135_v26 = vld [vmem:[%s300_s2] ss:$0 sm:$0xff] }
  0x1a   :  { %196 = vmatpush3.bf16.msra.mxu0 %v193_v5 }
  0x1b   :  { %198 = vmatprep.subr.bf16.mxu0 %v197_v8 }
  0x1e   :  { %200 = vmatpush3.bf16.msra.mxu0 %v197_v8 }
  0x1f   :  { %202 = vmatprep.subr.bf16.mxu0 %v201_v12 }
  0x22   :  { %204 = vmatpush3.bf16.msra.mxu0 %v201_v12 }
  0x23   :  { %206 = vmatprep.subr.bf16.mxu0 %v205_v15 }
  0x26   :  { %208 = vmatpush3.bf16.msra.mxu0 %v205_v15 }
  0x27   :  { %210 = vmatprep.subr.bf16.mxu0 %v209_v18 }
  0x2a   :  { %212 = vmatpush3.bf16.msra.mxu0 %v209_v18 }
  0x2b   :  { %214 = vmatprep.subr.bf16.mxu0 %v213_v21 }
  0x2e   :  { %216 = vmatpush3.bf16.msra.mxu0 %v213_v21 }
  0x2f   :  { %218 = vmatprep.subr.bf16.mxu0 %v217_v24 }
  0x32   :  { %220 = vmatpush3.bf16.msra.mxu0 %v217_v24 }
  0x35   :  { %187 = vmatmul.mubr.f32.vlgmr.msra.gmra.mrb[0].mxu0 %v29_v25 }
 0x108   :  { %v188_v27 = vpop.f32.mrb[0].mxu0 }
 0x109   :  { %v125_v28 = vadd.f32 %v188_v27, %v135_v26  ;;  %v119_v29 = vpop.f32.mrb[1].mxu0 }
 0x10a   :  { %v120_v30 = vadd.f32 %v135_v26, %v119_v29 }
 0x10b   :  { %129 = vst [vmem:[%s301_s3 + $0x8] sm:$0xff] %v125_v28 }
 0x10c   :  { %128 = vst [vmem:[%s301_s3] sm:$0xff] %v120_v30 }
 0x10d   :  { %134 = vsyncpa [#allocation3], 1 }

</bundles_post_ra>
